<compile_context>
chip_gen: v7x
topology: tpu7x:2x2x1
jax: 0.10.0
libtpu: 0.0.40
codegen_flags: <defaults>
</compile_context>

<pallas_src>
import jax
import jax.numpy as jnp
from jax import lax
from jax.experimental import pallas as pl
from jax.experimental.pallas import tpu as pltpu

_LANE = 128


def _cdiv(a, b):
    return -(-a // b)


def _make_dice_kernel(*, rows, s, chunk, n_inner, needs_mask):
    """Kernel for one (num, s, 128) block per grid step."""
    n_chunks = s // chunk

    def kernel(pred_ref, target_ref, inter_ref, denom_ref, inter_acc, denom_acc):
        o = pl.program_id(0)          # core axis (extent 1 unless num_cores > 1)
        k = pl.program_id(1)          # reduction axis over the flattened dim

        @pl.when(k == 0)
        def _init():
            inter_acc[...] = jnp.zeros_like(inter_acc)
            denom_acc[...] = jnp.zeros_like(denom_acc)

        num = pred_ref.shape[0]
        base = (o * n_inner + k) * s  # first global 128-lane row of this block
        if needs_mask:
            row_iota = lax.broadcasted_iota(jnp.int32, (num, chunk, _LANE), 1)

        # Consume the block in chunks so the f32 temporaries stay chunk-sized
        # (~1 MiB) instead of block-sized.
        @pl.loop(0, n_chunks)
        def _chunk(c):
            off = pl.multiple_of(c * chunk, chunk)
            p = pred_ref[:, pl.ds(off, chunk), :].astype(jnp.float32)
            t = target_ref[:, pl.ds(off, chunk), :].astype(jnp.float32)
            if needs_mask:
                # Zero out-of-bounds rows of the (boundary-padded) last block.
                valid = (row_iota + (base + off)) < rows
                p = jnp.where(valid, p, 0.0)
                t = jnp.where(valid, t, 0.0)
            # Fold sublanes into groups of 8 -> pure vreg-group VPU adds into tiny
            # accumulators; the cross-lane reduce happens once, in the wrapper.
            inter_acc[...] += jnp.sum((p * t).reshape(num, chunk // 8, 8, _LANE), axis=1)
            denom_acc[...] += jnp.sum((p + t).reshape(num, chunk // 8, 8, _LANE), axis=1)

        @pl.when(k == n_inner - 1)
        def _finalize():
            inter_ref[...] = inter_acc[...][None]
            denom_ref[...] = denom_acc[...][None]

    return kernel


def dice_loss(pred, target, smooth=1.0, *, num_cores=1,
              pipelined_input_bytes=16 * 1024 * 1024):
    """Pallas implementation of DiceLoss.forward. Returns (loss, {'loss/dice': loss})."""
    num = target.shape[0]
    pred2 = pred.reshape(num, -1)
    target2 = target.reshape(num, -1)

    # Floating inputs pass through unchanged (bf16 pred halves its HBM traffic).
    # bool/int mask targets go to bf16 (exact for {0,1} / small-int masks).
    if not jnp.issubdtype(pred2.dtype, jnp.floating):
        pred2 = pred2.astype(jnp.float32)
    if not jnp.issubdtype(target2.dtype, jnp.floating):
        target2 = target2.astype(jnp.bfloat16)

    d = pred2.shape[1]
    d_bulk = (d // _LANE) * _LANE
    d_tail = d - d_bulk
    rows = d_bulk // _LANE

    # Tiny tail (< 128 columns per sample) when D is not 128-aligned: reduce it with
    # plain jnp instead of padding/copying the full arrays in HBM.
    if d_tail:
        pt = pred2[:, d_bulk:].astype(jnp.float32)
        tt = target2[:, d_bulk:].astype(jnp.float32)
        tail_inter = jnp.sum(pt * tt, axis=1)
        tail_denom = jnp.sum(pt, axis=1) + jnp.sum(tt, axis=1)

    if rows == 0:
        if d_tail:
            inter, denom = tail_inter, tail_denom
        else:
            inter = jnp.zeros((num,), jnp.float32)
            denom = jnp.zeros((num,), jnp.float32)
    else:
        if d_tail:
            # Only the non-128-aligned case pays for this bulk slice; the aligned
            # fast path below is a free reshape (no extra HBM copy at all).
            pred_b, target_b = pred2[:, :d_bulk], target2[:, :d_bulk]
        else:
            pred_b, target_b = pred2, target2
        pred3 = pred_b.reshape(num, rows, _LANE)
        target3 = target_b.reshape(num, rows, _LANE)

        isp = pred3.dtype.itemsize
        ist = target3.dtype.itemsize
        # Sublane packing granularity: f32 -> 8, bf16/f16 -> 16.
        sub = max(8, 8 * (4 // isp), 8 * (4 // ist))

        # Largest block (sublane rows per grid step) keeping the pipelined input
        # buffers (2 inputs x 2 pipeline buffers) near the budget (default 16 MiB:
        # big enough to amortize the ~0.35us/step overhead, small enough for v7x).
        budget = min(int(pipelined_input_bytes), 24 * 1024 * 1024)
        s = budget // (2 * num * _LANE * (isp + ist))
        s = max(sub, (s // sub) * sub)
        s = min(s, _cdiv(rows, sub) * sub)          # never bigger than the data

        # Chunk rows so the in-kernel f32 temporaries stay ~1 MiB each.
        chunk = (1 << 20) // (num * _LANE * 4)
        chunk = max(sub, min(s, (chunk // sub) * sub))
        s = _cdiv(s, chunk) * chunk                 # block = whole number of chunks

        total_blocks = _cdiv(rows, s)
        n_inner = _cdiv(total_blocks, num_cores)
        needs_mask = (num_cores * n_inner * s) != rows

        if num_cores > 1:
            # Shard the reduction across TensorCores on multi-TC chips (v7x).
            last_block = total_blocks - 1

            def in_idx(o, k):       # clamp fully-OOB blocks; masking zeroes them
                return (0, jnp.minimum(o * n_inner + k, last_block), 0)

            dim_sem = (pltpu.CORE_PARALLEL, "arbitrary")
        else:
            def in_idx(o, k):
                return (0, k, 0)

            dim_sem = ("arbitrary", "arbitrary")

        # Scoped VMEM: double-buffered input blocks + chunk temporaries + accumulators
        # + slack.  With the defaults this lands around ~24-32 MiB -- under the ~48 MiB
        # portability cap so the same tiling fits v7x's 64 MiB physical VMEM.
        vmem_need = (2 * num * s * _LANE * (isp + ist)
                     + 8 * num * chunk * _LANE * 4
                     + 4 * num * 8 * _LANE * 4
                     + (4 << 20))
        vmem_limit = int(min(max(32 * 1024 * 1024, vmem_need), 48 * 1024 * 1024))

        kernel = _make_dice_kernel(rows=rows, s=s, chunk=chunk,
                                   n_inner=n_inner, needs_mask=needs_mask)

        part_shape = jax.ShapeDtypeStruct((num_cores, num, 8, _LANE), jnp.float32)
        cost = pl.CostEstimate(
            flops=5 * num * rows * _LANE,
            transcendentals=0,
            bytes_accessed=num * rows * _LANE * (isp + ist)
            + 2 * num_cores * num * 8 * _LANE * 4)

        inter_out, denom_out = pl.pallas_call(
            kernel,
            out_shape=(part_shape, part_shape),
            grid_spec=pltpu.PrefetchScalarGridSpec(
                num_scalar_prefetch=0,
                grid=(num_cores, n_inner),
                in_specs=[
                    pl.BlockSpec((num, s, _LANE), in_idx),
                    pl.BlockSpec((num, s, _LANE), in_idx),
                ],
                out_specs=[
                    pl.BlockSpec((1, num, 8, _LANE), lambda o, k: (o, 0, 0, 0)),
                    pl.BlockSpec((1, num, 8, _LANE), lambda o, k: (o, 0, 0, 0)),
                ],
                scratch_shapes=[
                    pltpu.VMEM((num, 8, _LANE), jnp.float32),
                    pltpu.VMEM((num, 8, _LANE), jnp.float32),
                ],
            ),
            compiler_params=pltpu.CompilerParams(
                dimension_semantics=dim_sem,
                vmem_limit_bytes=vmem_limit,
            ),
            cost_estimate=cost,
        )(pred3, target3)

        # Tiny final reduction + dice ratio on the partial sums (num*2*1024 elems).
        inter = jnp.sum(inter_out, axis=(0, 2, 3))        # (num,)
        denom = jnp.sum(denom_out, axis=(0, 2, 3))        # (num,) = sum(p)+sum(t)
        if d_tail:
            inter = inter + tail_inter
            denom = denom + tail_denom

    dice = (2.0 * inter + float(smooth)) / (denom + float(smooth))
    loss = 1.0 - jnp.sum(dice) / num
    return loss, {"loss/dice": loss}


def dice_loss_ref(pred, target, smooth=1.0):
    num = target.shape[0]
    p = pred.reshape(num, -1).astype(jnp.float32)
    t = target.reshape(num, -1).astype(jnp.float32)
    inter = (p * t).sum(axis=1)
    dice = (2.0 * inter + smooth) / (p.sum(axis=1) + t.sum(axis=1) + smooth)
    return 1.0 - dice.sum() / num


if __name__ == "__main__":
    SMOOTH = 1.0  # options.DICE.SMOOTH
    key = jax.random.PRNGKey(0)
    kp, kt = jax.random.split(key)

    def check(pred, target, name, tol=1e-5, **kw):
        loss, aux = dice_loss(pred, target, smooth=SMOOTH, **kw)
        loss = jax.block_until_ready(loss)
        ref = dice_loss_ref(pred, target, smooth=SMOOTH)
        assert jnp.allclose(loss, ref, rtol=tol, atol=tol), (name, loss, ref)
        assert jnp.allclose(aux["loss/dice"], ref, rtol=tol, atol=tol), name

    # 1) Base case: NCHW float pred + float {0,1} target, D % 128 == 0 (copy-free path).
    N, C, H, W = 2, 4, 16, 16
    pred = jax.nn.sigmoid(jax.random.normal(kp, (N, C, H, W), dtype=jnp.float32))
    target = (jax.random.uniform(kt, (N, C, H, W)) > 0.5).astype(jnp.float32)
    check(pred, target, "base")

    # 2) Non-128-divisible flattened dim + bool mask: in-kernel boundary masking,
    #    bf16 target cast, and the tiny jnp tail.
    H2, W2 = 15, 15
    pred_b = jax.nn.sigmoid(jax.random.normal(kp, (N, C, H2, W2), dtype=jnp.float32))
    target_b = jax.random.uniform(kt, (N, C, H2, W2)) > 0.5          # bool mask
    check(pred_b, target_b, "ragged")

    # 3) bf16 pred + bool mask target (both stream as 2-byte operands).
    pred_c = pred.astype(jnp.bfloat16)
    target_c = jax.random.uniform(kt, (N, C, H, W)) > 0.5            # bool mask
    loss_c, _ = dice_loss(pred_c, target_c, smooth=SMOOTH)
    loss_c = jax.block_until_ready(loss_c)
    ref_c = dice_loss_ref(pred_c.astype(jnp.float32),
                          target_c.astype(jnp.float32), smooth=SMOOTH)
    assert jnp.allclose(loss_c, ref_c, rtol=1e-4, atol=1e-4), (loss_c, ref_c)

    # 4) Larger aligned case: exercises the in-kernel chunk loop (n_chunks > 1).
    N4, C4, H4, W4 = 2, 4, 256, 256
    pred_d = jax.nn.sigmoid(jax.random.normal(kp, (N4, C4, H4, W4), dtype=jnp.float32))
    target_d = (jax.random.uniform(kt, (N4, C4, H4, W4)) > 0.5).astype(jnp.float32)
    check(pred_d, target_d, "chunked")

    # 5) Same data with a small tile budget: exercises the multi-step grid reduction
    #    (init at k==0, accumulate, finalize at k==last).
    check(pred_d, target_d, "multistep", pipelined_input_bytes=1 << 20)

    print("KERNEL_OK")
</pallas_src>

<mosaic_0001>
module attributes {stable_mosaic.version = 11 : i64} {
  func.func @kernel(%arg0: i32, %arg1: i32, %arg2: memref<2x8x128xf32, #tpu.memory_space<vmem>>, %arg3: memref<2x8x128xf32, #tpu.memory_space<vmem>>, %arg4: memref<1x2x8x128xf32, #tpu.memory_space<vmem>>, %arg5: memref<1x2x8x128xf32, #tpu.memory_space<vmem>>, %arg6: memref<2x8x128xf32, #tpu.memory_space<vmem>>, %arg7: memref<2x8x128xf32, #tpu.memory_space<vmem>>) attributes {dimension_semantics = [#tpu.dimension_semantics<arbitrary>, #tpu.dimension_semantics<arbitrary>], iteration_bounds = array<i64: 1, 1>, scalar_prefetch = 0 : i64, scratch_operands = 2 : i64, tpu.core_type = #tpu.core_type<tc>, window_params = [{transform_indices = @transform_0, window_bounds = array<i64: 2, 8, 128>}, {transform_indices = @transform_1, window_bounds = array<i64: 2, 8, 128>}, {transform_indices = @transform_2, window_bounds = array<i64: 1, 2, 8, 128>}, {transform_indices = @transform_3, window_bounds = array<i64: 1, 2, 8, 128>}]} {
    %c0_i32 = arith.constant 0 : i32
    %0 = arith.cmpi eq, %arg1, %c0_i32 : i32
    %1 = arith.extui %0 : i1 to i32
    %c0_i32_0 = arith.constant 0 : i32
    %2 = arith.cmpi ne, %1, %c0_i32_0 : i32
    scf.if %2 {
      %cst_22 = arith.constant 0.000000e+00 : f32
      %26 = vector.broadcast %cst_22 : f32 to vector<2x8x128xf32>
      %c0_23 = arith.constant 0 : index
      %c0_24 = arith.constant 0 : index
      %c0_25 = arith.constant 0 : index
      %27 = vector.load %arg6[%c0_23, %c0_24, %c0_25] : memref<2x8x128xf32, #tpu.memory_space<vmem>>, vector<2x8x128xf32>
      tpu.vector_store %arg6[%c0_23, %c0_24, %c0_25], %26 {strides = array<i32>} : memref<2x8x128xf32, #tpu.memory_space<vmem>>, vector<2x8x128xf32>,
      %cst_26 = arith.constant 0.000000e+00 : f32
      %28 = vector.broadcast %cst_26 : f32 to vector<2x8x128xf32>
      %c0_27 = arith.constant 0 : index
      %c0_28 = arith.constant 0 : index
      %c0_29 = arith.constant 0 : index
      %29 = vector.load %arg7[%c0_27, %c0_28, %c0_29] : memref<2x8x128xf32, #tpu.memory_space<vmem>>, vector<2x8x128xf32>
      tpu.vector_store %arg7[%c0_27, %c0_28, %c0_29], %28 {strides = array<i32>} : memref<2x8x128xf32, #tpu.memory_space<vmem>>, vector<2x8x128xf32>,
    } else {
    }
    %c0_i32_1 = arith.constant 0 : i32
    %c1_i32 = arith.constant 1 : i32
    %3 = arith.muli %c0_i32_1, %c1_i32 : i32
    %c0_i32_2 = arith.constant 0 : i32
    %4 = arith.addi %c0_i32_2, %3 : i32
    %c8_i32 = arith.constant 8 : i32
    %5 = arith.muli %4, %c8_i32 : i32
    %6 = tpu.assume_multiple %5, 8 : i32
    %c0 = arith.constant 0 : index
    %7 = arith.index_cast %6 : i32 to index
    %c0_3 = arith.constant 0 : index
    %8 = vector.load %arg2[%c0, %7, %c0_3] : memref<2x8x128xf32, #tpu.memory_space<vmem>>, vector<2x8x128xf32>
    %c0_4 = arith.constant 0 : index
    %9 = arith.index_cast %6 : i32 to index
    %c0_5 = arith.constant 0 : index
    %10 = vector.load %arg3[%c0_4, %9, %c0_5] : memref<2x8x128xf32, #tpu.memory_space<vmem>>, vector<2x8x128xf32>
    %c0_6 = arith.constant 0 : index
    %c0_7 = arith.constant 0 : index
    %c0_8 = arith.constant 0 : index
    %11 = vector.load %arg6[%c0_6, %c0_7, %c0_8] : memref<2x8x128xf32, #tpu.memory_space<vmem>>, vector<2x8x128xf32>
    %12 = arith.mulf %8, %10 : vector<2x8x128xf32>
    %13 = vector.shape_cast %12 : vector<2x8x128xf32> to vector<2x1x8x128xf32>
    %cst = arith.constant dense<0.000000e+00> : vector<2x8x128xf32>
    %14 = vector.multi_reduction <add>, %13, %cst [1] : vector<2x1x8x128xf32> to vector<2x8x128xf32>
    %15 = arith.addf %11, %14 : vector<2x8x128xf32>
    %c0_9 = arith.constant 0 : index
    %c0_10 = arith.constant 0 : index
    %c0_11 = arith.constant 0 : index
    %16 = vector.load %arg6[%c0_9, %c0_10, %c0_11] : memref<2x8x128xf32, #tpu.memory_space<vmem>>, vector<2x8x128xf32>
    tpu.vector_store %arg6[%c0_9, %c0_10, %c0_11], %15 {strides = array<i32>} : memref<2x8x128xf32, #tpu.memory_space<vmem>>, vector<2x8x128xf32>,
    %c0_12 = arith.constant 0 : index
    %c0_13 = arith.constant 0 : index
    %c0_14 = arith.constant 0 : index
    %17 = vector.load %arg7[%c0_12, %c0_13, %c0_14] : memref<2x8x128xf32, #tpu.memory_space<vmem>>, vector<2x8x128xf32>
    %18 = arith.addf %8, %10 : vector<2x8x128xf32>
    %19 = vector.shape_cast %18 : vector<2x8x128xf32> to vector<2x1x8x128xf32>
    %cst_15 = arith.constant dense<0.000000e+00> : vector<2x8x128xf32>
    %20 = vector.multi_reduction <add>, %19, %cst_15 [1] : vector<2x1x8x128xf32> to vector<2x8x128xf32>
    %21 = arith.addf %17, %20 : vector<2x8x128xf32>
    %c0_16 = arith.constant 0 : index
    %c0_17 = arith.constant 0 : index
    %c0_18 = arith.constant 0 : index
    %22 = vector.load %arg7[%c0_16, %c0_17, %c0_18] : memref<2x8x128xf32, #tpu.memory_space<vmem>>, vector<2x8x128xf32>
    tpu.vector_store %arg7[%c0_16, %c0_17, %c0_18], %21 {strides = array<i32>} : memref<2x8x128xf32, #tpu.memory_space<vmem>>, vector<2x8x128xf32>,
    %c1_i32_19 = arith.constant 1 : i32
    %c0_i32_20 = arith.constant 0 : i32
    %23 = arith.cmpi eq, %arg1, %c0_i32_20 : i32
    %24 = arith.extui %23 : i1 to i32
    %c0_i32_21 = arith.constant 0 : i32
    %25 = arith.cmpi ne, %24, %c0_i32_21 : i32
    scf.if %25 {
      %c0_22 = arith.constant 0 : index
      %c0_23 = arith.constant 0 : index
      %c0_24 = arith.constant 0 : index
      %26 = vector.load %arg6[%c0_22, %c0_23, %c0_24] : memref<2x8x128xf32, #tpu.memory_space<vmem>>, vector<2x8x128xf32>
      %27 = vector.shape_cast %26 : vector<2x8x128xf32> to vector<1x2x8x128xf32>
      %c0_25 = arith.constant 0 : index
      %c0_26 = arith.constant 0 : index
      %c0_27 = arith.constant 0 : index
      %c0_28 = arith.constant 0 : index
      %28 = vector.load %arg4[%c0_25, %c0_26, %c0_27, %c0_28] : memref<1x2x8x128xf32, #tpu.memory_space<vmem>>, vector<1x2x8x128xf32>
      tpu.vector_store %arg4[%c0_25, %c0_26, %c0_27, %c0_28], %27 {strides = array<i32>} : memref<1x2x8x128xf32, #tpu.memory_space<vmem>>, vector<1x2x8x128xf32>,
      %c0_29 = arith.constant 0 : index
      %c0_30 = arith.constant 0 : index
      %c0_31 = arith.constant 0 : index
      %29 = vector.load %arg7[%c0_29, %c0_30, %c0_31] : memref<2x8x128xf32, #tpu.memory_space<vmem>>, vector<2x8x128xf32>
      %30 = vector.shape_cast %29 : vector<2x8x128xf32> to vector<1x2x8x128xf32>
      %c0_32 = arith.constant 0 : index
      %c0_33 = arith.constant 0 : index
      %c0_34 = arith.constant 0 : index
      %c0_35 = arith.constant 0 : index
      %31 = vector.load %arg5[%c0_32, %c0_33, %c0_34, %c0_35] : memref<1x2x8x128xf32, #tpu.memory_space<vmem>>, vector<1x2x8x128xf32>
      tpu.vector_store %arg5[%c0_32, %c0_33, %c0_34, %c0_35], %30 {strides = array<i32>} : memref<1x2x8x128xf32, #tpu.memory_space<vmem>>, vector<1x2x8x128xf32>,
    } else {
    }
    return
  }
  func.func @transform_0(%arg0: i32, %arg1: i32) -> (i32, i32, i32) {
    %c0_i32 = arith.constant 0 : i32
    %c0_i32_0 = arith.constant 0 : i32
    %c0_i32_1 = arith.constant 0 : i32
    return %c0_i32, %arg1, %c0_i32_0 : i32, i32, i32
  }
  func.func @transform_1(%arg0: i32, %arg1: i32) -> (i32, i32, i32) {
    %c0_i32 = arith.constant 0 : i32
    %c0_i32_0 = arith.constant 0 : i32
    %c0_i32_1 = arith.constant 0 : i32
    return %c0_i32, %arg1, %c0_i32_0 : i32, i32, i32
  }
  func.func @transform_2(%arg0: i32, %arg1: i32) -> (i32, i32, i32, i32) {
    %c0_i32 = arith.constant 0 : i32
    %c0_i32_0 = arith.constant 0 : i32
    %c0_i32_1 = arith.constant 0 : i32
    %c0_i32_2 = arith.constant 0 : i32
    return %arg0, %c0_i32, %c0_i32_0, %c0_i32_1 : i32, i32, i32, i32
  }
  func.func @transform_3(%arg0: i32, %arg1: i32) -> (i32, i32, i32, i32) {
    %c0_i32 = arith.constant 0 : i32
    %c0_i32_0 = arith.constant 0 : i32
    %c0_i32_1 = arith.constant 0 : i32
    %c0_i32_2 = arith.constant 0 : i32
    return %arg0, %c0_i32, %c0_i32_0, %c0_i32_1 : i32, i32, i32, i32
  }
}

</mosaic_0001>

<bundles_post_ra>
// kernel: tpu_custom_call.1
= control target key start
LH: loop header
LB: loop body
LE: loop exit
PB: predicated region body
PF: predicated region fallthrough
CT: control target
= control target key end

     0   :  { %9 = vsyncpa [#allocation5], 0  ;;  %s315_s0 = inlined_call_operand.hbm [shape: f32[2,8,128], index: 0, kind: input, shape index: {}]   ;;  %s316_s1 = inlined_call_operand.hbm [shape: f32[2,8,128], index: 1, kind: input, shape index: {}]   ;;  %s317_s2 = inlined_call_operand.hbm [shape: f32[1,2,8,128], index: 2, kind: output, shape index: {0}]   ;;  %s318_s3 = inlined_call_operand.hbm [shape: f32[1,2,8,128], index: 3, kind: output, shape index: {1}]  }
   0x1   :  { %10 = vsyncpa [#allocation8], 0 }
   0x2   :  { %11 = vsyncpa [#allocation6], 0 }
   0x3   :  { %12 = vsyncpa [#allocation11], 0  ;;  %s222_s12 = smov [#allocation4]   ;;  %s126_s16 = scalar_lea.hbm %s315_s0, 256 }
   0x4   :  { %s18_s13 = sshll.u32 %s222_s12, 4  ;;  %p127_p0 = scmp.ne.s32.totalorder %s315_s0, %s126_s16  ;;  %s19_s13 = int_to_ptr.vmem [resolvable:$true] %s18_s13 }
   0x5   :  { %p130_p1 = scmp.lt.u32.totalorder %s126_s16, %s315_s0 }
   0x7   :  { %p132_p2 = pnand %p130_p1, %p127_p0 }
   0x9   :  { %135 = shalt.err (!%p132_p2)
}
   0xa   :  { %s136_s21 = scalar_lea.vmem %s19_s13, 256  ;;  %p141_p4 = scmp.lt.s32.totalorder %s19_s13, %s19_s13 }
   0xb   :  { %p137_p3 = scmp.ne.s32.totalorder %s19_s13, %s136_s21  ;;  %p142_p5 = scmp.lt.s32.totalorder %s136_s21, %s136_s21 }
   0xd   :  { %p143_p6 = por %p142_p5, %p141_p4 }
   0xf   :  { %p144_p7 = pnand %p143_p6, %p137_p3 }
  0x11   :  { %147 = shalt.err (!%p144_p7)
}
  0x12   :  { %s223_s22 = smov 128   ;;  %s224_s23 = smov 8  }
  0x13   :  { %24 = dma.hbm_to_vmem [thread:$0]  %s315_s0, 256, %s19_s13, [#allocation5], %s223_s22, %s223_s22, %s224_s23  }
  0x14   :  { %s225_s26 = smov [#allocation7]   ;;  %s148_s30 = scalar_lea.hbm %s316_s1, 256 }
  0x15   :  { %s30_s27 = sshll.u32 %s225_s26, 4  ;;  %p149_p8 = scmp.ne.s32.totalorder %s316_s1, %s148_s30  ;;  %s31_s27 = int_to_ptr.vmem [resolvable:$true] %s30_s27 }
  0x16   :  { %p152_p9 = scmp.lt.u32.totalorder %s148_s30, %s316_s1 }
  0x18   :  { %p154_p10 = pnand %p152_p9, %p149_p8 }
  0x1a   :  { %157 = shalt.err (!%p154_p10)
}
  0x1b   :  { %s158_s8 = scalar_lea.vmem %s31_s27, 256  ;;  %p163_p12 = scmp.lt.s32.totalorder %s31_s27, %s31_s27 }
  0x1c   :  { %p159_p11 = scmp.ne.s32.totalorder %s31_s27, %s158_s8  ;;  %p164_p13 = scmp.lt.s32.totalorder %s158_s8, %s158_s8 }
  0x1e   :  { %p165_p0 = por %p164_p13, %p163_p12 }
  0x20   :  { %p166_p1 = pnand %p165_p0, %p159_p11 }
  0x22   :  { %169 = shalt.err (!%p166_p1)
}
  0x23   :  { %36 = dma.hbm_to_vmem [thread:$0]  %s316_s1, 256, %s31_s27, [#allocation8], %s223_s22, %s223_s22, %s224_s23  }
  0x24   :  { %214 = dma.done.wait [#allocation5], 256  }
  0x25   :  { %215 = vsyncadd [#allocation5], 4294967040 }
  0x26   :  { %216 = dma.done.wait [#allocation8], 256  }
  0x27   :  { %217 = vsyncadd [#allocation8], 4294967040  ;;  %s226_s10 = smov [#allocation9]   ;;  %v51_v0 = vld [vmem:[#allocation4] sm:$0xff]  ;;  %v53_v1 = vld [vmem:[#allocation7] sm:$0xff]  ;;  %s227_s12 = smov [#allocation10]  }
  0x28   :  { %s91_s11 = sshll.u32 %s226_s10, 4  ;;  %v52_v2 = vld [vmem:[#allocation4 + $0x8] sm:$0xff]  ;;  %s103_s13 = sshll.u32 %s227_s12, 4  ;;  %v57_v3 = vmul.f32 %v53_v1, %v51_v0  ;;  %v54_v4 = vld [vmem:[#allocation7 + $0x8] sm:$0xff]  ;;  %v67_v5 = vadd.f32 %v53_v1, %v51_v0  ;;  %s92_s11 = int_to_ptr.vmem [resolvable:$true] %s91_s11  ;;  %s278_s13 = int_to_ptr.vmem [resolvable:$true] %s103_s13 }
  0x29   :  { %v58_v6 = vmul.f32 %v54_v4, %v52_v2  ;;  %v68_v7 = vadd.f32 %v54_v4, %v52_v2  ;;  %s170_s1 = scalar_lea.vmem %s92_s11, 256  ;;  %p175_p3 = scmp.lt.s32.totalorder %s92_s11, %s92_s11 }
  0x2a   :  { %80 = vst [vmem:[#allocation9] sm:$0xff] %v57_v3  ;;  %84 = vst [vmem:[#allocation10] sm:$0xff] %v67_v5  ;;  %p171_p2 = scmp.ne.s32.totalorder %s92_s11, %s170_s1  ;;  %p176_p4 = scmp.lt.s32.totalorder %s170_s1, %s170_s1 }
  0x2b   :  { %81 = vst [vmem:[#allocation9 + $0x8] sm:$0xff] %v58_v6  ;;  %85 = vst [vmem:[#allocation10 + $0x8] sm:$0xff] %v68_v7 }
  0x2c   :  { %p177_p5 = por %p176_p4, %p175_p3 }
  0x2e   :  { %p178_p6 = pnand %p177_p5, %p171_p2 }
  0x30   :  { %181 = shalt.err (!%p178_p6)
}
  0x31   :  { %s182_s16 = scalar_lea.hbm %s317_s2, 256 }
  0x32   :  { %p183_p7 = scmp.ne.s32.totalorder %s317_s2, %s182_s16  ;;  %p186_p8 = scmp.lt.u32.totalorder %s182_s16, %s317_s2 }
  0x34   :  { %p188_p9 = pnand %p186_p8, %p183_p7 }
  0x36   :  { %191 = shalt.err (!%p188_p9)
}
  0x37   :  { %97 = dma.vmem_to_hbm [thread:$0]  %s92_s11, 256, %s317_s2, [#allocation6], %s223_s22, %s223_s22, %s224_s23  }
  0x38   :  { %s192_s25 = scalar_lea.vmem %s278_s13, 256  ;;  %p197_p11 = scmp.lt.s32.totalorder %s278_s13, %s278_s13 }
  0x39   :  { %p193_p10 = scmp.ne.s32.totalorder %s278_s13, %s192_s25  ;;  %p198_p12 = scmp.lt.s32.totalorder %s192_s25, %s192_s25 }
  0x3b   :  { %p199_p13 = por %p198_p12, %p197_p11 }
  0x3d   :  { %p200_p0 = pnand %p199_p13, %p193_p10 }
  0x3f   :  { %203 = shalt.err (!%p200_p0)
}
  0x40   :  { %s204_s28 = scalar_lea.hbm %s318_s3, 256 }
  0x41   :  { %p205_p1 = scmp.ne.s32.totalorder %s318_s3, %s204_s28  ;;  %p208_p2 = scmp.lt.u32.totalorder %s204_s28, %s318_s3 }
  0x43   :  { %p210_p3 = pnand %p208_p2, %p205_p1 }
  0x45   :  { %213 = shalt.err (!%p210_p3)
}
  0x46   :  { %109 = dma.vmem_to_hbm [thread:$0]  %s278_s13, 256, %s318_s3, [#allocation11], %s223_s22, %s223_s22, %s224_s23  }
  0x47   :  { %218 = dma.done.wait [#allocation6], 256  }
  0x48   :  { %219 = vsyncadd [#allocation6], 4294967040 }
  0x49   :  { %220 = dma.done.wait [#allocation11], 256  }
  0x4a   :  { %221 = vsyncadd [#allocation11], 4294967040 }
  0x4b   :  { %116 = vsyncpa [#allocation5], 1 }
  0x4c   :  { %117 = vsyncpa [#allocation8], 1 }
  0x4d   :  { %118 = vsyncpa [#allocation6], 1 }
  0x4e   :  { %119 = vsyncpa [#allocation11], 1 }

</bundles_post_ra>
